<compile_context>
chip_gen: v7x
topology: tpu7x:2x2x1
jax: 0.10.0
libtpu: 0.0.40
codegen_flags: <defaults>
</compile_context>

<pallas_src>
import functools

import jax
import jax.numpy as jnp
from jax import lax
from jax.experimental import pallas as pl
from jax.experimental.pallas import tpu as pltpu


def _detect_kernel(x_ref, w1_ref, shift_ref, w2_ref, b2_ref, out_ref,
                   *, tile, wp, negative_slope, split_k, matmul_dtype):
    # x_ref:     (1, P, 3*Cin)   dx-prepacked, spatially padded image (resident per batch, f32)
    # w1_ref:    (9*Cin, C1)     fused 3x3 conv weights with BN scale folded in (bf16)
    # shift_ref: (1, C1)         folded BN shift (f32)
    # w2_ref:    (C1, Cp)        1x1 conv weights, out-channels zero-padded to 128k (bf16)
    # b2_ref:    (1, Cp)         1x1 conv bias, zero-padded (f32)
    # out_ref:   (1, TILE, Cp)   lane-dense output tile (bf16)
    t = pl.program_id(1)
    cin3 = x_ref.shape[-1]            # 3*Cin (the dx taps are pre-packed along channels)

    def tap(dy):
        # Sublane-aligned dynamic row slice: tile and wp are both multiples of 8.
        start = pl.multiple_of(t * tile + dy * wp, 8)
        return x_ref[0, pl.ds(start, tile), :].astype(matmul_dtype)

    if split_k:
        # Very large Cin: 3 accumulated K=3*Cin matmuls avoid a huge fused LHS temp.
        acc = jnp.zeros((tile, w1_ref.shape[-1]), jnp.float32)
        for dy in range(3):
            acc = acc + jnp.dot(tap(dy), w1_ref[pl.ds(dy * cin3, cin3), :],
                                preferred_element_type=jnp.float32)
    else:
        # Small/medium Cin: one fused K=9*Cin MXU matmul.
        lhs = jnp.concatenate([tap(0), tap(1), tap(2)], axis=-1)      # (TILE, 9*Cin) bf16
        acc = jnp.dot(lhs, w1_ref[...], preferred_element_type=jnp.float32)

    # BN scale is already folded into w1; add the shift and apply LeakyReLU(0.1).
    h = acc + shift_ref[...]
    h = jnp.maximum(h, negative_slope * h)

    # 1x1 conv (+ bias) as a second MXU matmul; output is 128-lane padded bf16.
    out = jnp.dot(h.astype(w2_ref.dtype), w2_ref[...],
                  preferred_element_type=jnp.float32) + b2_ref[...]
    out_ref[0] = out.astype(out_ref.dtype)


def _pick_tile(nout, batch, tile_hw):
    """Largest 8-aligned tile <= tile_hw that (a) yields >= 4 total grid steps so
    both v7x TensorCores get work and (b) divides nout evenly when possible."""
    min_steps = 4
    nt_min = max(1, -(-min_steps // max(1, batch)))
    cap = min(tile_hw, nout, -(-nout // nt_min))
    cap = max(8, (cap // 8) * 8)
    for t in range(cap, 7, -8):                 # prefer no garbage tail tile
        if nout % t == 0:
            return t
    return cap


def detect_forward(x_nchw, w1, bn_gamma, bn_beta, bn_mean, bn_var, w2, b2,
                   num_anchors, num_classes, *, eps=1e-5, tile_hw=512,
                   matmul_dtype=jnp.bfloat16):
    """Pallas implementation of Detect.forward.  x_nchw: (B, Cin, H, W) float32."""
    B, Cin, H, W = x_nchw.shape
    C1 = 2 * Cin
    Cout2 = num_anchors * (5 + num_classes)
    Hp = H + 2
    Wp8 = ((W + 2 + 7) // 8) * 8          # padded width, rounded up to a multiple of 8

    # ---- glue (pure layout): NCHW -> spatially padded NHWC, dx taps pre-packed ----
    x_nhwc = jnp.transpose(x_nchw, (0, 2, 3, 1))                          # (B, H, W, Cin)
    x_pad = jnp.pad(x_nhwc, ((0, 0), (1, 1), (1, Wp8 - W - 1), (0, 0)))   # (B, Hp, Wp8, Cin)
    n_rows = Hp * Wp8
    x_flat = x_pad.reshape(B, n_rows, Cin)
    x_ext = jnp.pad(x_flat, ((0, 0), (0, 2), (0, 0)))
    # Row r of the packed image holds the 3 dx taps [r, r+1, r+2] channel-concatenated,
    # so the kernel only needs the 3 dy taps at row offsets dy*Wp8.
    x_packed = jnp.concatenate([x_ext[:, 0:n_rows], x_ext[:, 1:n_rows + 1],
                                x_ext[:, 2:n_rows + 2]], axis=-1)         # (B, n_rows, 3*Cin)

    # The kernel evaluates the conv at every padded-width position (H*Wp8 rows per
    # image); the wrap-around columns are discarded after the call.
    nout = H * Wp8
    tile = _pick_tile(nout, B, tile_hw)
    nt = -(-nout // tile)
    nout_pad = nt * tile
    p_need = nout_pad + 2 * Wp8            # last row the last tile's dy=2 tap may touch
    if p_need > n_rows:
        x_packed = jnp.pad(x_packed, ((0, 0), (0, p_need - n_rows), (0, 0)))

    # Fused 3x3 weights (kh, kw, I, O) -> (9*Cin, C1), tap-major K, BN scale folded in.
    inv_std = 1.0 / jnp.sqrt(bn_var + eps)
    scale = bn_gamma * inv_std                                            # (C1,)
    w1_f = (jnp.transpose(w1, (2, 3, 1, 0)).reshape(9 * Cin, C1)
            * scale[None, :]).astype(matmul_dtype)
    shift = (bn_beta - bn_mean * scale).reshape(1, C1).astype(jnp.float32)

    # 1x1 conv: pad output channels up to a multiple of 128 for lane-dense stores.
    cp = ((Cout2 + 127) // 128) * 128
    w2_m = jnp.transpose(w2[:, :, 0, 0], (1, 0))                          # (C1, Cout2)
    w2_p = jnp.pad(w2_m, ((0, 0), (0, cp - Cout2))).astype(matmul_dtype)
    b2_p = jnp.pad(b2.reshape(1, Cout2), ((0, 0), (0, cp - Cout2))).astype(jnp.float32)

    split_k = Cin >= 512     # per review: split the fused K only for very large Cin
    kernel = functools.partial(_detect_kernel, tile=tile, wp=Wp8, negative_slope=0.1,
                               split_k=split_k, matmul_dtype=matmul_dtype)

    # Explicit VMEM budget: resident packed image (double-buffered across the batch
    # axis), bf16 output blocks, weights and in-kernel temporaries; capped at 60% of
    # the queried per-core VMEM so v7x (64 MiB) keeps headroom for compiler scratch.
    blk_bytes = (2 * p_need * 3 * Cin * x_packed.dtype.itemsize
                 + 2 * tile * cp * 2
                 + (9 * Cin * C1 + C1 * cp) * 2 + (C1 + cp) * 4
                 + tile * (9 * Cin * 2 + C1 * 4 + 2 * cp * 4))
    try:
        vmem_cap = pltpu.get_tpu_info().vmem_capacity_bytes
    except Exception:
        vmem_cap = 64 * 1024 * 1024
    vmem_limit = int(min(int(0.6 * vmem_cap), max(8 * 1024 * 1024, 2 * blk_bytes)))

    out_flat = pl.pallas_call(
        kernel,
        out_shape=jax.ShapeDtypeStruct((B, nout_pad, cp), jnp.bfloat16),
        grid_spec=pltpu.PrefetchScalarGridSpec(
            num_scalar_prefetch=0,
            grid=(B, nt),
            in_specs=[
                # Full packed image per batch, resident across the HW-tile axis.
                pl.BlockSpec((1, p_need, 3 * Cin), lambda b, t: (b, 0, 0)),
                pl.BlockSpec((9 * Cin, C1), lambda b, t: (0, 0)),
                pl.BlockSpec((1, C1), lambda b, t: (0, 0)),
                pl.BlockSpec((C1, cp), lambda b, t: (0, 0)),
                pl.BlockSpec((1, cp), lambda b, t: (0, 0)),
            ],
            out_specs=pl.BlockSpec((1, tile, cp), lambda b, t: (b, t, 0)),
        ),
        compiler_params=pltpu.CompilerParams(
            dimension_semantics=("parallel", "parallel"),
            vmem_limit_bytes=vmem_limit),
    )(x_packed, w1_f, shift, w2_p, b2_p)

    # Drop padding: HW tail rows, wrap-around columns, padded channels; back to f32.
    out = out_flat[:, :nout, :Cout2].astype(jnp.float32)
    out = out.reshape(B, H, Wp8, Cout2)[:, :, :W, :]
    # (B, H, W, A*(5+C)) -> (B, s, s, A, 5+C)  ==  torch permute(0, 3, 4, 1, 2)
    return out.reshape(B, H, W, num_anchors, 5 + num_classes)


def _reference_forward(x_nchw, w1, bn_gamma, bn_beta, bn_mean, bn_var, w2, b2,
                       num_anchors, num_classes, eps=1e-5):
    """Plain-JAX reference mirroring the PyTorch module (eval-mode BN)."""
    B, Cin, H, W = x_nchw.shape
    y = lax.conv_general_dilated(x_nchw, w1, (1, 1), 'SAME',
                                 dimension_numbers=('NCHW', 'OIHW', 'NCHW'))
    scale = bn_gamma / jnp.sqrt(bn_var + eps)
    shift = bn_beta - bn_mean * scale
    y = y * scale[None, :, None, None] + shift[None, :, None, None]
    y = jnp.where(y > 0, y, 0.1 * y)
    y = lax.conv_general_dilated(y, w2, (1, 1), 'VALID',
                                 dimension_numbers=('NCHW', 'OIHW', 'NCHW'))
    y = y + b2[None, :, None, None]
    y = y.reshape(B, num_anchors, 5 + num_classes, H, W)
    return jnp.transpose(y, (0, 3, 4, 1, 2))


if __name__ == "__main__":
    # Small, deterministic setup consistent with the module.
    B, Cin, S = 2, 4, 16
    num_anchors, num_classes = 3, 5
    C1 = 2 * Cin
    Cout2 = num_anchors * (5 + num_classes)

    key = jax.random.PRNGKey(0)
    ks = jax.random.split(key, 8)
    x = jax.random.normal(ks[0], (B, Cin, S, S), dtype=jnp.float32)

    # Parameters, deterministically initialized (shapes follow __init__).
    w1 = jax.random.normal(ks[1], (C1, Cin, 3, 3), dtype=jnp.float32) * 0.1   # conv3x3, no bias
    bn_gamma = 1.0 + 0.1 * jax.random.normal(ks[2], (C1,), dtype=jnp.float32)
    bn_beta = 0.1 * jax.random.normal(ks[3], (C1,), dtype=jnp.float32)
    bn_mean = 0.1 * jax.random.normal(ks[4], (C1,), dtype=jnp.float32)
    bn_var = jnp.abs(jax.random.normal(ks[5], (C1,), dtype=jnp.float32)) + 0.5
    w2 = jax.random.normal(ks[6], (Cout2, C1, 1, 1), dtype=jnp.float32) * 0.1  # conv1x1
    b2 = 0.1 * jax.random.normal(ks[7], (Cout2,), dtype=jnp.float32)

    # Default tile_hw; the min-grid-steps rule splits the 16x16 map into 2 HW tiles
    # per image, so the demo exercises the (B, HW-tiles) grid with 4 grid steps.
    out = detect_forward(x, w1, bn_gamma, bn_beta, bn_mean, bn_var, w2, b2,
                         num_anchors, num_classes)
    out = jax.block_until_ready(out)

    ref = _reference_forward(x, w1, bn_gamma, bn_beta, bn_mean, bn_var, w2, b2,
                             num_anchors, num_classes)
    assert out.shape == (B, S, S, num_anchors, 5 + num_classes), out.shape
    # bf16 MXU inputs / bf16 output stores with f32 accumulation -> loose tolerance.
    assert jnp.allclose(out, ref, atol=3e-2, rtol=3e-2)

    print("KERNEL_OK")
</pallas_src>

<mosaic_0001>
module attributes {stable_mosaic.version = 11 : i64} {
  func.func @_detect_kernel(%arg0: i32, %arg1: i32, %arg2: memref<1x432x12xf32, #tpu.memory_space<vmem>>, %arg3: memref<36x8xbf16, #tpu.memory_space<vmem>>, %arg4: memref<1x8xf32, #tpu.memory_space<vmem>>, %arg5: memref<8x128xbf16, #tpu.memory_space<vmem>>, %arg6: memref<1x128xf32, #tpu.memory_space<vmem>>, %arg7: memref<1x192x128xbf16, #tpu.memory_space<vmem>>) attributes {dimension_semantics = [#tpu.dimension_semantics<parallel>, #tpu.dimension_semantics<parallel>], iteration_bounds = array<i64: 2, 2>, scalar_prefetch = 0 : i64, scratch_operands = 0 : i64, tpu.core_type = #tpu.core_type<tc>, window_params = [{transform_indices = @transform_0, window_bounds = array<i64: 1, 432, 12>}, {pipeline_mode = #tpu.pipeline_mode<synchronous>, transform_indices = @transform_1, window_bounds = array<i64: 36, 8>}, {pipeline_mode = #tpu.pipeline_mode<synchronous>, transform_indices = @transform_2, window_bounds = array<i64: 1, 8>}, {pipeline_mode = #tpu.pipeline_mode<synchronous>, transform_indices = @transform_3, window_bounds = array<i64: 8, 128>}, {pipeline_mode = #tpu.pipeline_mode<synchronous>, transform_indices = @transform_4, window_bounds = array<i64: 1, 128>}, {transform_indices = @transform_5, window_bounds = array<i64: 1, 192, 128>}]} {
    %c192_i32 = arith.constant 192 : i32
    %0 = arith.muli %arg1, %c192_i32 : i32
    %c0_i32 = arith.constant 0 : i32
    %1 = arith.addi %0, %c0_i32 : i32
    %2 = tpu.assume_multiple %1, 8 : i32
    %c0 = arith.constant 0 : index
    %3 = arith.index_cast %2 : i32 to index
    %c0_0 = arith.constant 0 : index
    %4 = vector.load %arg2[%c0, %3, %c0_0] : memref<1x432x12xf32, #tpu.memory_space<vmem>>, vector<1x192x12xf32>
    %5 = vector.shape_cast %4 : vector<1x192x12xf32> to vector<192x12xf32>
    %6 = arith.truncf %5 : vector<192x12xf32> to vector<192x12xbf16>
    %c192_i32_1 = arith.constant 192 : i32
    %7 = arith.muli %arg1, %c192_i32_1 : i32
    %c24_i32 = arith.constant 24 : i32
    %8 = arith.addi %7, %c24_i32 : i32
    %9 = tpu.assume_multiple %8, 8 : i32
    %c0_2 = arith.constant 0 : index
    %10 = arith.index_cast %9 : i32 to index
    %c0_3 = arith.constant 0 : index
    %11 = vector.load %arg2[%c0_2, %10, %c0_3] : memref<1x432x12xf32, #tpu.memory_space<vmem>>, vector<1x192x12xf32>
    %12 = vector.shape_cast %11 : vector<1x192x12xf32> to vector<192x12xf32>
    %13 = arith.truncf %12 : vector<192x12xf32> to vector<192x12xbf16>
    %c192_i32_4 = arith.constant 192 : i32
    %14 = arith.muli %arg1, %c192_i32_4 : i32
    %c48_i32 = arith.constant 48 : i32
    %15 = arith.addi %14, %c48_i32 : i32
    %16 = tpu.assume_multiple %15, 8 : i32
    %c0_5 = arith.constant 0 : index
    %17 = arith.index_cast %16 : i32 to index
    %c0_6 = arith.constant 0 : index
    %18 = vector.load %arg2[%c0_5, %17, %c0_6] : memref<1x432x12xf32, #tpu.memory_space<vmem>>, vector<1x192x12xf32>
    %19 = vector.shape_cast %18 : vector<1x192x12xf32> to vector<192x12xf32>
    %20 = arith.truncf %19 : vector<192x12xf32> to vector<192x12xbf16>
    %21 = tpu.concatenate %6, %13, %20 in 1 : vector<192x12xbf16>, vector<192x12xbf16>, vector<192x12xbf16> -> vector<192x36xbf16>
    %c0_7 = arith.constant 0 : index
    %c0_8 = arith.constant 0 : index
    %22 = vector.load %arg3[%c0_7, %c0_8] : memref<36x8xbf16, #tpu.memory_space<vmem>>, vector<36x8xbf16>
    %cst = arith.constant dense<0.000000e+00> : vector<192x8xf32>
    %23 = tpu.matmul %21, %22, %cst {dimension_numbers = #tpu.dot_dimension_numbers<[1], [0], [0], [1], [0, 0, 1, 1], [], []>} : vector<192x36xbf16>, vector<36x8xbf16>, vector<192x8xf32> -> vector<192x8xf32>
    %c0_9 = arith.constant 0 : index
    %c0_10 = arith.constant 0 : index
    %24 = vector.load %arg4[%c0_9, %c0_10] : memref<1x8xf32, #tpu.memory_space<vmem>>, vector<1x8xf32>
    %25 = vector.broadcast %24 : vector<1x8xf32> to vector<192x8xf32>
    %26 = arith.addf %23, %25 : vector<192x8xf32>
    %cst_11 = arith.constant 1.000000e-01 : f32
    %27 = vector.broadcast %cst_11 : f32 to vector<192x8xf32>
    %28 = arith.mulf %27, %26 : vector<192x8xf32>
    %29 = arith.maximumf %26, %28 : vector<192x8xf32>
    %30 = arith.truncf %29 : vector<192x8xf32> to vector<192x8xbf16>
    %c0_12 = arith.constant 0 : index
    %c0_13 = arith.constant 0 : index
    %31 = vector.load %arg5[%c0_12, %c0_13] : memref<8x128xbf16, #tpu.memory_space<vmem>>, vector<8x128xbf16>
    %cst_14 = arith.constant dense<0.000000e+00> : vector<192x128xf32>
    %32 = tpu.matmul %30, %31, %cst_14 {dimension_numbers = #tpu.dot_dimension_numbers<[1], [0], [0], [1], [0, 0, 1, 1], [], []>} : vector<192x8xbf16>, vector<8x128xbf16>, vector<192x128xf32> -> vector<192x128xf32>
    %c0_15 = arith.constant 0 : index
    %c0_16 = arith.constant 0 : index
    %33 = vector.load %arg6[%c0_15, %c0_16] : memref<1x128xf32, #tpu.memory_space<vmem>>, vector<1x128xf32>
    %34 = vector.broadcast %33 : vector<1x128xf32> to vector<192x128xf32>
    %35 = arith.addf %32, %34 : vector<192x128xf32>
    %36 = arith.truncf %35 : vector<192x128xf32> to vector<192x128xbf16>
    %c0_17 = arith.constant 0 : index
    %c0_18 = arith.constant 0 : index
    %c0_19 = arith.constant 0 : index
    %37 = vector.load %arg7[%c0_17, %c0_18, %c0_19] : memref<1x192x128xbf16, #tpu.memory_space<vmem>>, vector<1x192x128xbf16>
    %38 = vector.shape_cast %37 : vector<1x192x128xbf16> to vector<192x128xbf16>
    %39 = vector.shape_cast %36 : vector<192x128xbf16> to vector<1x192x128xbf16>
    tpu.vector_store %arg7[%c0_17, %c0_18, %c0_19], %39 {strides = array<i32>} : memref<1x192x128xbf16, #tpu.memory_space<vmem>>, vector<1x192x128xbf16>,
    return
  }
  func.func @transform_0(%arg0: i32, %arg1: i32) -> (i32, i32, i32) {
    %c0_i32 = arith.constant 0 : i32
    %c0_i32_0 = arith.constant 0 : i32
    %c0_i32_1 = arith.constant 0 : i32
    return %arg0, %c0_i32, %c0_i32_0 : i32, i32, i32
  }
  func.func @transform_1(%arg0: i32, %arg1: i32) -> (i32, i32) {
    %c0_i32 = arith.constant 0 : i32
    %c0_i32_0 = arith.constant 0 : i32
    %c0_i32_1 = arith.constant 0 : i32
    return %c0_i32, %c0_i32_0 : i32, i32
  }
  func.func @transform_2(%arg0: i32, %arg1: i32) -> (i32, i32) {
    %c0_i32 = arith.constant 0 : i32
    %c0_i32_0 = arith.constant 0 : i32
    %c0_i32_1 = arith.constant 0 : i32
    return %c0_i32, %c0_i32_0 : i32, i32
  }
  func.func @transform_3(%arg0: i32, %arg1: i32) -> (i32, i32) {
    %c0_i32 = arith.constant 0 : i32
    %c0_i32_0 = arith.constant 0 : i32
    %c0_i32_1 = arith.constant 0 : i32
    return %c0_i32, %c0_i32_0 : i32, i32
  }
  func.func @transform_4(%arg0: i32, %arg1: i32) -> (i32, i32) {
    %c0_i32 = arith.constant 0 : i32
    %c0_i32_0 = arith.constant 0 : i32
    %c0_i32_1 = arith.constant 0 : i32
    return %c0_i32, %c0_i32_0 : i32, i32
  }
  func.func @transform_5(%arg0: i32, %arg1: i32) -> (i32, i32, i32) {
    %c0_i32 = arith.constant 0 : i32
    %c0_i32_0 = arith.constant 0 : i32
    return %arg0, %arg1, %c0_i32 : i32, i32, i32
  }
}

</mosaic_0001>

<bundles_post_ra>
// kernel: tpu_custom_call.1
= control target key start
LH: loop header
LB: loop body
LE: loop exit
PB: predicated region body
PF: predicated region fallthrough
CT: control target
= control target key end

     0   :  { %10 = vsyncpa [#allocation3], 0  ;;  %s2022_s0 = inlined_call_operand.vmem [shape: f32[2,432,12], index: 0, kind: input, shape index: {}]   ;;  %s2023_s1 = inlined_call_operand.vmem [shape: bf16[36,8], index: 1, kind: input, shape index: {}]   ;;  %s2024_s2 = inlined_call_operand.vmem [shape: f32[1,8], index: 2, kind: input, shape index: {}]   ;;  %s2025_s3 = inlined_call_operand.vmem [shape: bf16[8,128], index: 3, kind: input, shape index: {}]   ;;  %s2026_s4 = inlined_call_operand.vmem [shape: f32[1,128], index: 4, kind: input, shape index: {}]   ;;  %s2027_s5 = inlined_call_operand.hbm [shape: bf16[2,384,128], index: 5, kind: output, shape index: {}]  }
   0x1   :  { %12 = vsyncpa [#allocation3 + $0x1], 0  ;;  %s1633_s18 = smov 0   ;;  %s1635_s19 = smov 0  }
   0x2   :  { %s1637_s20 = smov 0   ;;  %s1639_s21 = smov 0  }
   0x3   :  { %s1641_s22 = smov 0   ;;  %s1643_s23 = smov 0  }
   0x4   :  { %s1645_s24 = smov 0   ;;  %s1647_s25 = smov 0  }
   0x5 LB: > { %s1130_s26 = sadd.s32 4294967295, %s1596_s25   ;;  %s1131_s27 = sadd.s32 4294967294, %s1596_s25   ;;  %s1596_s25 = sphi %s1647_s25, %s18_s25   ;;  %s1592_s24 = sphi %s1645_s24, %s2036_s24   ;;  %s1588_s23 = sphi %s1643_s23, %s2035_s23   ;;  %s1584_s22 = sphi %s1641_s22, %s2034_s22   ;;  %s1580_s21 = sphi %s1639_s21, %s2033_s21   ;;  %s1576_s20 = sphi %s1637_s20, %s2032_s20   ;;  %s1572_s19 = sphi %s1635_s19, %s2031_s19   ;;  %s1568_s18 = sphi %s1633_s18, %s2030_s18  }
   0x6   : > { %s27_s28 = sadd.s32 1, %s1588_s23  ;;  %s30_s29 = sadd.s32 1, %s1592_s24 }
   0x7   : > { %p28_p0 = scmp.ge.s32.totalorder %s27_s28, 2  ;;  %p159_p1 = scmp.ne.s32.totalorder %s1576_s20, %s1572_s19 }
   0x8   : > { %p160_p2 = scmp.eq.s32.totalorder %s1130_s26, 3  ;;  %p165_p5 = scmp.ne.s32.totalorder %s1572_s19, %s1568_s18 }
   0x9   : > { %s2038_s28 = smov (%p28_p0, %s27_s28), 0  ;;  %s2040_s29 = smov (!%p28_p0, %s30_s29), %s1592_s24 }
   0xa   : > { %s145_s30 = ssub.s32 %s1588_s23, %s2038_s28  ;;  %p1684_p3 = por %p160_p2, %p159_p1 }
   0xb   : > { %p32_p4 = scmp.ge.s32.totalorder %s2040_s29, 2  ;;  %p166_p6 = scmp.eq.s32.totalorder %s1131_s27, 3 }
   0xc   : > { %p1134_p7 = scmp.ge.s32.totalorder %s1596_s25, 1  ;;  %p204_p9 = scmp.lt.s32.totalorder %s1596_s25, 5 }
   0xd   : > { %s2042_s29 = smov (%p32_p4, %s2040_s29), 0  ;;  %p1693_p8 = por %p166_p6, %p165_p5 }
   0xe   : > { %s144_s8 = ssub.s32 %s1592_s24, %s2042_s29  ;;  %s149_s9 = sadd.s32 1, %s1576_s20 }
   0xf   : > { %s146_s10 = sor.u32 %s145_s30, %s144_s8  ;;  %p205_p10 = pnand %p1134_p7, %p204_p9 }
  0x10   : > { %p147_p11 = scmp.eq.s32.totalorder %s146_s10, 0  ;;  %p232_p12 = scmp.lt.s32.totalorder (!%p205_p10), %s1584_s22, 1  ;;  %v1499_v0 = vld [vmem:[%s2023_s1] sm:$0xff] (!%p205_p10)   ;;  %v1500_v1 = vld [vmem:[%s2023_s1 + $0x8] sm:$0xff] (!%p205_p10)   ;;  %vm539_vm0 = vcmask (!%p205_p10), 1041408   ;;  %vm425_vm1 = vcmask (!%p205_p10), 97280  }
  0x11   : > { %208 = sbr.rel (%p205_p10) target bundleno = 653 (0x28d), region = 40  ;;  %1363 = vmatprep.subr.bf16.mxu0 (!%p205_p10), %v1499_v0  ;;  %v1501_v2 = vld [vmem:[%s2023_s1 + $0x10] ss:$0 sps:$4 sm:$0x33] (!%p205_p10)   ;;  %s1598_s13 = smov (!%p205_p10), 24   ;;  %vm462_vm2 = vcmask (!%p205_p10), 195584  }
  0x12   : > { %s1702_s11 = scalar_select %p147_p11, %s1576_s20, %s149_s9  }
  0x13   : > { %s239_s17 = smul.u32 (!%p205_p10), 192, %s1580_s21  ;;  %1364 = vmatpush3.bf16.msra.mxu0 (!%p205_p10), %v1499_v0  ;;  %v541_v12 = vsel (!%p205_p10), %vm539_vm0, %v1501_v2, 0  ;;  %s1599_s14 = smov (!%p205_p10), 12   ;;  %vm514_vm3 = vcmask (!%p205_p10), 293888   ;;  %vm777_vm4 = vcmask (!%p205_p10), 1043456   ;;  %vm740_vm5 = vcmask (!%p205_p10), 64512  }
  0x14   : > { %1365 = vmatprep.subr.bf16.mxu0 (!%p205_p10), %v1500_v1  ;;  %s229_s27 = sand.u32 (!%p205_p10), 1, %s1572_s19   ;;  %s1600_s8 = smov (!%p205_p10), [#allocation2]  }
  0x15   : > { %s1421_s9 = smul.u32 (!%p205_p10), 96, %s229_s27 }
  0x17   : > { %1366 = vmatpush3.bf16.msra.mxu0 (!%p205_p10), %v1500_v1 }
  0x18   : > { %s233_s16 = scalar_select %p232_p12, %s1584_s22, 1  ;;  %1419 = vmatprep.subr.msk.bf16.mxu0 %vm539_vm0, %v1501_v2 }
  0x1a   : > { %s1422_s26 = smul.u32 432, %s233_s16 }
  0x1b   : > { %1368 = vmatpush3.bf16.msra.mxu0 %v541_v12 }
  0x1c   : > { %s236_s10 = scalar_lea.vmem %s2022_s0, %s1422_s26  ;;  %s1970_s26 = scalar_lea.sflag [#allocation3], %s229_s27 }
  0x1d   : > { %s1719_s12 = scalar_lea.vmem %s236_s10, %s239_s17  ;;  %s1924_s10 = scalar_lea.vmem [#allocation2], %s1421_s9 }
  0x1e   : > { %v1160_v3 = vld [vmem:[%s1719_s12 + $0x30] sm:$0xff]  ;;  %v1161_v4 = vld [vmem:[%s1719_s12 + $0x38] sm:$0xff]  ;;  %v1729_v7 = vld [vmem:[%s1719_s12 + $0x20] sm:$0xff]  ;;  %s1046_s15 = sshll.u32 %s1924_s10, 4  ;;  %s1506_s9 = sshll.u32 %s1600_s8, 4  ;;  %s1964_s15 = int_to_ptr.vmem [resolvable:$true] %s1046_s15  ;;  %s1507_s9 = int_to_ptr.vmem [resolvable:$false] %s1506_s9 }
  0x1f   : > { %v1724_v5 = vld [vmem:[%s1719_s12 + $0x18] sm:$0xff]  ;;  %v1726_v6 = vpack.c.bf16 %v1161_v4, %v1160_v3  ;;  %v1162_v8 = vld [vmem:[%s1719_s12 + $0x40] sm:$0xff]  ;;  %v1163_v9 = vld [vmem:[%s1719_s12 + $0x48] sm:$0xff]  ;;  %s1502_s30 = scalar_lea.vmem %s1964_s15, 1536  ;;  %p1509_p2 = scmp.lt.s32.totalorder %s1964_s15, %s1507_s9 }
  0x20   : > { %v303_v10 = vpack.c.bf16 %v1729_v7, %v1724_v5  ;;  %v1736_v11 = vld [vmem:[%s1719_s12 + $0x28] sm:$0xff]  ;;  %v1740_v13 = vpack.c.bf16 %v1163_v9, %v1162_v8  ;;  %v1143_v16 = vld [vmem:[%s1719_s12 + $0x50] sm:$0xff]  ;;  %v305_v18 = vpack.c.bf16 %v1162_v8, %v1161_v4  ;;  %v1166_v19 = vld [vmem:[%s1719_s12 + $0x60] sm:$0xff]  ;;  %p1503_p13 = scmp.ne.s32.totalorder %s1964_s15, %s1502_s30 }
  0x21   : > { %401 = vrot.lane.b32.xlu1 %v1726_v6, %s1598_s13  ;;  %v267_v14 = vpack.c.bf16 %v1736_v11, %v1729_v7  ;;  %v304_v15 = vpack.c.bf16 %v1160_v3, %v1736_v11  ;;  %v306_v17 = vpack.c.bf16 %v1143_v16, %v1163_v9  ;;  %v1167_v20 = vld [vmem:[%s1719_s12 + $0x68] sm:$0xff]  ;;  %v1165_v21 = vld [vmem:[%s1719_s12 + $0x58] sm:$0xff]  ;;  %v1754_v22 = vld [vmem:[%s1719_s12 + $0x10] sm:$0xff] }
  0x22   : > { %365 = vrot.lane.b32.xlu0 %v303_v10, %s1599_s14  ;;  %v266_v23 = vpack.c.bf16 %v1724_v5, %v1754_v22  ;;  %v1759_v24 = vpack.c.bf16 %v1167_v20, %v1166_v19  ;;  %v1762_v25 = vpack.c.bf16 %v1165_v21, %v1143_v16  ;;  %v1147_v26 = vld [vmem:[%s1719_s12 + $0x70] sm:$0xff]  ;;  %v307_v28 = vpack.c.bf16 %v1166_v19, %v1165_v21  ;;  %v1170_v29 = vld [vmem:[%s1719_s12 + $0x80] sm:$0xff]  ;;  %v1171_v30 = vld [vmem:[%s1719_s12 + $0x88] sm:$0xff]  ;;  %p1504_p0 = pnand %p1503_p13, %p1684_p3 }
  0x23   : > { %v308_v27 = vpack.c.bf16 %v1147_v26, %v1167_v20  ;;  %v1169_v31 = vld [vmem:[%s1719_s12 + $0x78] sm:$0xff]  ;;  %v1773_v32 = vpack.c.bf16 %v1171_v30, %v1170_v29  ;;  %v1151_v34 = vld [vmem:[%s1719_s12 + $0x90] sm:$0xff]  ;;  %v1174_v37 = vld [vmem:[%s1719_s12 + $0xa0] sm:$0xff] }
  0x24   : > { %v1776_v33 = vpack.c.bf16 %v1169_v31, %v1147_v26  ;;  %v310_v35 = vpack.c.bf16 %v1151_v34, %v1171_v30  ;;  %v309_v36 = vpack.c.bf16 %v1170_v29, %v1169_v31  ;;  %v1175_v38 = vld [vmem:[%s1719_s12 + $0xa8] sm:$0xff]  ;;  %v1173_v39 = vld [vmem:[%s1719_s12 + $0x98] sm:$0xff]  ;;  %v1155_v42 = vld [vmem:[%s1719_s12 + $0xb0] sm:$0xff]  ;;  %p1505_p1 = pneg %p1504_p0 }
  0x25   : > { %403 = vrot.lane.b32.xlu1 %v1740_v13, %s1598_s13  ;;  %v1787_v40 = vpack.c.bf16 %v1175_v38, %v1174_v37  ;;  %v1790_v41 = vpack.c.bf16 %v1173_v39, %v1151_v34  ;;  %v312_v43 = vpack.c.bf16 %v1155_v42, %v1175_v38  ;;  %v311_v44 = vpack.c.bf16 %v1174_v37, %v1173_v39  ;;  %v1178_v45 = vld [vmem:[%s1719_s12 + $0xc0] sm:$0xff]  ;;  %v1179_v46 = vld [vmem:[%s1719_s12 + $0xc8] sm:$0xff]  ;;  %v1177_v47 = vld [vmem:[%s1719_s12 + $0xb8] sm:$0xff] }
  0x26   : > { %367 = vrot.lane.b32.xlu0 %v304_v15, %s1599_s14  ;;  %v350_v48 = vpack.c.bf16 %v1179_v46, %v1178_v45  ;;  %v1802_v49 = vpack.c.bf16 %v1177_v47, %v1155_v42  ;;  %v1159_v50 = vld [vmem:[%s1719_s12 + $0xd0] sm:$0xff]  ;;  %v313_v52 = vpack.c.bf16 %v1178_v45, %v1177_v47  ;;  %v1182_v53 = vld [vmem:[%s1719_s12 + $0xe0] sm:$0xff]  ;;  %v1183_v54 = vld [vmem:[%s1719_s12 + $0xe8] sm:$0xff] }
  0x27   : > { %v314_v51 = vpack.c.bf16 %v1159_v50, %v1179_v46  ;;  %v1181_v55 = vld [vmem:[%s1719_s12 + $0xd8] sm:$0xff]  ;;  %v352_v56 = vpack.c.bf16 %v1183_v54, %v1182_v53  ;;  %v241_v58 = vld [vmem:[%s1719_s12] sm:$0xff]  ;;  %v242_v59 = vld [vmem:[%s1719_s12 + $0x8] sm:$0xff]  ;;  %s1038_s12 = smul.u32 24, %s1580_s21 }
  0x28   : > { %v351_v57 = vpack.c.bf16 %v1181_v55, %v1159_v50  ;;  %v265_v60 = vpack.c.bf16 %v242_v59, %v241_v58  ;;  %v732_v46 = vld [vmem:[%s2025_s3] sm:$0xf] }
  0x29   : > { %371 = vrot.lane.b32.xlu1 %v306_v17, %s1599_s14  ;;  %1420 = vmatprep.subr.msk.bf16.mxu1 %vm777_vm4, %v732_v46  ;;  %v779_v47 = vsel %vm777_vm4, %v732_v46, 0 }
  0x2a   : > { %369 = vrot.lane.b32.xlu0 %v305_v18, %s1599_s14  ;;  %1394 = vmatpush3.bf16.msra.mxu1 %v779_v47 }
  0x2d   : > { %407 = vrot.lane.b32.xlu1 %v1759_v24, %s1598_s13 }
  0x2e   : > { %405 = vrot.lane.b32.xlu0 %v1762_v25, %s1598_s13 }
  0x31   : > { %375 = vrot.lane.b32.xlu1 %v308_v27, %s1599_s14 }
  0x32   : > { %373 = vrot.lane.b32.xlu0 %v307_v28, %s1599_s14 }
  0x35   : > { %411 = vrot.lane.b32.xlu1 %v1773_v32, %s1598_s13 }
  0x36   : > { %409 = vrot.lane.b32.xlu0 %v1776_v33, %s1598_s13 }
  0x39   : > { %379 = vrot.lane.b32.xlu1 %v310_v35, %s1599_s14 }
  0x3a   : > { %377 = vrot.lane.b32.xlu0 %v309_v36, %s1599_s14 }
  0x3d   : > { %415 = vrot.lane.b32.xlu1 %v1787_v40, %s1598_s13 }
  0x3e   : > { %413 = vrot.lane.b32.xlu0 %v1790_v41, %s1598_s13 }
  0x41   : > { %383 = vrot.lane.b32.xlu1 %v312_v43, %s1599_s14 }
  0x42   : > { %381 = vrot.lane.b32.xlu0 %v311_v44, %s1599_s14 }
  0x45   : > { %419 = vrot.lane.b32.xlu1 %v350_v48, %s1598_s13 }
  0x46   : > { %417 = vrot.lane.b32.xlu0 %v1802_v49, %s1598_s13 }
  0x49   : > { %387 = vrot.lane.b32.xlu1 %v314_v51, %s1599_s14 }
  0x4a   : > { %385 = vrot.lane.b32.xlu0 %v313_v52, %s1599_s14 }
  0x4d   : > { %423 = vrot.lane.b32.xlu1 %v352_v56, %s1598_s13 }
  0x4e   : > { %421 = vrot.lane.b32.xlu0 %v351_v57, %s1598_s13  ;;  %s1423_s13 = smul.u32 48, %s1584_s22 }
  0x50   : > { %s1043_s14 = sadd.s32 %s1423_s13, %s1038_s12  ;;  %s1508_s12 = scalar_lea.vmem %s1507_s9, 3072 }
  0x51   : > { %s1237_s21 = sshll.u32 %s1043_s14, 6  ;;  %p1510_p4 = scmp.lt.s32.totalorder %s1508_s12, %s1502_s30 }
  0x52   : > { %s1962_s17 = scalar_lea.hbm %s2027_s5, %s1237_s21 }
  0x53   : > { %p1511_p5 = por %p1510_p4, %p1509_p2 }
  0x55   : > { %p1512_p6 = pnand %p1511_p5, %p1505_p1 }
  0x93   : > { %v402_v61 = vpop.permute.xlu1 %401 }
  0x94   : > { %v366_v62 = vpop.permute.xlu0 %365 }
  0x95   : > { %v428_v63 = vsel %vm425_vm1, %v265_v60, %v366_v62 }
  0x96   : > { %v464_v0 = vsel %vm462_vm2, %v428_v63, %v402_v61 }
  0x97   : > { %1369 = vmatprep.mubr.msk.bf16.mxu0 %vm514_vm3, %v464_v0  ;;  %v404_v1 = vpop.permute.xlu1 %403 }
  0x98   : > { %v368_v2 = vpop.permute.xlu0 %367 }
  0x99   : > { %v431_v3 = vsel %vm425_vm1, %v266_v23, %v368_v2 }
  0x9a   : > { %v466_v4 = vsel %vm462_vm2, %v431_v3, %v404_v1 }
  0x9b   : > { %1370 = vmatmul.mubr.msk.bf16.vlgmr.msra.gmra.mrb[0].mxu0 %vm514_vm3, %v466_v4  ;;  %v372_v8 = vpop.permute.xlu1 %371 }
  0x9c   : > { %v370_v9 = vpop.permute.xlu0 %369  ;;  %v437_v10 = vsel %vm425_vm1, %v1726_v6, %v372_v8 }
  0x9d   : > { %v434_v15 = vsel %vm425_vm1, %v267_v14, %v370_v9 }
  0x9f   : > { %v408_v12 = vpop.permute.xlu1 %407 }
  0xa0   : > { %v470_v16 = vsel %vm462_vm2, %v437_v10, %v408_v12  ;;  %v406_v5 = vpop.permute.xlu0 %405 }
  0xa1   : > { %v468_v17 = vsel %vm462_vm2, %v434_v15, %v406_v5 }
  0xa2   : > { %1373 = vmatprep.mubr.msk.bf16.mxu0 %vm514_vm3, %v468_v17 }
  0xa3   : > { %1374 = vmatmul.mubr.msk.bf16.gmra.mrb[4].mxu0 %vm514_vm3, %v470_v16  ;;  %v376_v18 = vpop.permute.xlu1 %375 }
  0xa4   : > { %v374_v19 = vpop.permute.xlu0 %373  ;;  %v443_v6 = vsel %vm425_vm1, %v1762_v25, %v376_v18 }
  0xa5   : > { %v440_v7 = vsel %vm425_vm1, %v1740_v13, %v374_v19 }
  0xa7   : > { %v412_v20 = vpop.permute.xlu1 %411 }
  0xa8   : > { %v474_v11 = vsel %vm462_vm2, %v443_v6, %v412_v20  ;;  %v410_v14 = vpop.permute.xlu0 %409 }
  0xa9   : > { %v472_v21 = vsel %vm462_vm2, %v440_v7, %v410_v14 }
  0xaa   : > { %1377 = vmatprep.mubr.msk.bf16.mxu0 %vm514_vm3, %v472_v21 }
  0xab   : > { %1378 = vmatmul.mubr.msk.bf16.gmra.mrb[8].mxu0 %vm514_vm3, %v474_v11  ;;  %v380_v22 = vpop.permute.xlu1 %379 }
  0xac   : > { %v378_v23 = vpop.permute.xlu0 %377  ;;  %v449_v26 = vsel %vm425_vm1, %v1776_v33, %v380_v22 }
  0xad   : > { %v446_v25 = vsel %vm425_vm1, %v1759_v24, %v378_v23 }
  0xaf   : > { %v416_v27 = vpop.permute.xlu1 %415 }
  0xb0   : > { %v478_v13 = vsel %vm462_vm2, %v449_v26, %v416_v27  ;;  %v414_v28 = vpop.permute.xlu0 %413 }
  0xb1   : > { %v476_v29 = vsel %vm462_vm2, %v446_v25, %v414_v28 }
  0xb2   : > { %1381 = vmatprep.mubr.msk.bf16.mxu0 %vm514_vm3, %v476_v29 }
  0xb3   : > { %1382 = vmatmul.mubr.msk.bf16.gmra.mrb[12].mxu0 %vm514_vm3, %v478_v13  ;;  %v384_v30 = vpop.permute.xlu1 %383 }
  0xb4   : > { %v382_v31 = vpop.permute.xlu0 %381  ;;  %v455_v34 = vsel %vm425_vm1, %v1790_v41, %v384_v30 }
  0xb5   : > { %v452_v33 = vsel %vm425_vm1, %v1773_v32, %v382_v31 }
  0xb7   : > { %v420_v35 = vpop.permute.xlu1 %419 }
  0xb8   : > { %v482_v24 = vsel %vm462_vm2, %v455_v34, %v420_v35  ;;  %v418_v36 = vpop.permute.xlu0 %417 }
  0xb9   : > { %v480_v37 = vsel %vm462_vm2, %v452_v33, %v418_v36 }
  0xba   : > { %1385 = vmatprep.mubr.msk.bf16.mxu0 %vm514_vm3, %v480_v37 }
  0xbb   : > { %1386 = vmatmul.mubr.msk.bf16.gmra.mrb[16].mxu0 %vm514_vm3, %v482_v24  ;;  %v388_v38 = vpop.permute.xlu1 %387 }
  0xbc   : > { %v386_v39 = vpop.permute.xlu0 %385  ;;  %v461_v42 = vsel %vm425_vm1, %v1802_v49, %v388_v38 }
  0xbd   : > { %v458_v41 = vsel %vm425_vm1, %v1787_v40, %v386_v39  ;;  %v1874_v40 = vld [vmem:[%s2024_s2] ss:$0 sm:$0xff] }
  0xbf   : > { %v424_v43 = vpop.permute.xlu1 %423 }
  0xc0   : > { %v486_v32 = vsel %vm462_vm2, %v461_v42, %v424_v43  ;;  %v422_v44 = vpop.permute.xlu0 %421 }
  0xc1   : > { %v484_v45 = vsel %vm462_vm2, %v458_v41, %v422_v44 }
  0xc2   : > { %1389 = vmatprep.mubr.msk.bf16.mxu0 %vm514_vm3, %v484_v45 }
  0xc3   : > { %1390 = vmatmul.mubr.msk.bf16.gmra.mrb[20].mxu0 %vm514_vm3, %v486_v32 }
 0x16e   : > { %v1371_v48 = vpop.f32.mrb[0].mxu0 }
 0x16f   : > { %v586_v49 = vadd.f32 %v1371_v48, %v1874_v40  ;;  %v577_v50 = vpop.f32.mrb[1].mxu0 }
 0x170   : > { %v578_v51 = vadd.f32 %v1874_v40, %v577_v50  ;;  %v1372_v52 = vpop.f32.mrb[2].mxu0 }
 0x171   : > { %v674_v53 = vmul.f32 0.1, %v586_v49  ;;  %v589_v54 = vadd.f32 %v1372_v52, %v1874_v40  ;;  %v580_v55 = vpop.f32.mrb[3].mxu0 }
 0x172   : > { %v672_v56 = vmul.f32 0.1, %v578_v51  ;;  %v581_v57 = vadd.f32 %v1874_v40, %v580_v55 }
 0x173   : > { %v675_v58 = vmul.f32 0.1, %v589_v54  ;;  %v698_v60 = vmax.f32 %v586_v49, %v674_v53 }
 0x174   : > { %v673_v59 = vmul.f32 0.1, %v581_v57  ;;  %v696_v62 = vmax.f32 %v578_v51, %v672_v56 }
 0x175   : > { %v699_v61 = vmax.f32 %v589_v54, %v675_v58 }
 0x176   : > { %v697_v63 = vmax.f32 %v581_v57, %v673_v59  ;;  %v1375_v0 = vpop.f32.mrb[4].mxu0 }
 0x177   : > { %v721_v1 = vpack.c.bf16 %v699_v61, %v698_v60  ;;  %v602_v2 = vadd.f32 %v1375_v0, %v1874_v40  ;;  %v593_v3 = vpop.f32.mrb[5].mxu0 }
 0x178   : > { %v594_v4 = vadd.f32 %v1874_v40, %v593_v3  ;;  %v1376_v8 = vpop.f32.mrb[6].mxu0  ;;  %v720_v9 = vpack.c.bf16 %v697_v63, %v696_v62 }
 0x179   : > { %v678_v10 = vmul.f32 0.1, %v602_v2  ;;  %v605_v12 = vadd.f32 %v1376_v8, %v1874_v40  ;;  %v596_v15 = vpop.f32.mrb[7].mxu0 }
 0x17a   : > { %v676_v16 = vmul.f32 0.1, %v594_v4  ;;  %v597_v5 = vadd.f32 %v1874_v40, %v596_v15  ;;  %1395 = vmatprep.mubr.msk.bf16.mxu1 %vm740_vm5, %v720_v9 }
 0x17b   : > { %v679_v17 = vmul.f32 0.1, %v605_v12  ;;  %1396 = vmatmul.mubr.msk.bf16.vlgmr.msra.gmra.mrb[0].mxu1 %vm740_vm5, %v721_v1  ;;  %v702_v19 = vmax.f32 %v602_v2, %v678_v10 }
 0x17c   : > { %v677_v18 = vmul.f32 0.1, %v597_v5  ;;  %v700_v20 = vmax.f32 %v594_v4, %v676_v16 }
 0x17d   : > { %v703_v6 = vmax.f32 %v605_v12, %v679_v17 }
 0x17e   : > { %v701_v7 = vmax.f32 %v597_v5, %v677_v18  ;;  %v1379_v11 = vpop.f32.mrb[8].mxu0 }
 0x17f   : > { %v723_v14 = vpack.c.bf16 %v703_v6, %v702_v19  ;;  %v618_v21 = vadd.f32 %v1379_v11, %v1874_v40  ;;  %v609_v22 = vpop.f32.mrb[9].mxu0 }
 0x180   : > { %v722_v23 = vpack.c.bf16 %v701_v7, %v700_v20  ;;  %v610_v26 = vadd.f32 %v1874_v40, %v609_v22  ;;  %v1380_v27 = vpop.f32.mrb[10].mxu0 }
 0x181   : > { %v682_v25 = vmul.f32 0.1, %v618_v21  ;;  %v621_v13 = vadd.f32 %v1380_v27, %v1874_v40  ;;  %v612_v28 = vpop.f32.mrb[11].mxu0 }
 0x182   : > { %v680_v29 = vmul.f32 0.1, %v610_v26  ;;  %v613_v30 = vadd.f32 %v1874_v40, %v612_v28  ;;  %1399 = vmatprep.mubr.msk.bf16.mxu1 %vm740_vm5, %v722_v23 }
 0x183   : > { %v683_v31 = vmul.f32 0.1, %v621_v13  ;;  %1400 = vmatmul.mubr.msk.bf16.gmra.mrb[4].mxu1 %vm740_vm5, %v723_v14  ;;  %v706_v35 = vmax.f32 %v618_v21, %v682_v25 }
 0x184   : > { %v681_v34 = vmul.f32 0.1, %v613_v30  ;;  %v704_v24 = vmax.f32 %v610_v26, %v680_v29 }
 0x185   : > { %v707_v33 = vmax.f32 %v621_v13, %v683_v31 }
 0x186   : > { %v705_v36 = vmax.f32 %v613_v30, %v681_v34  ;;  %v1383_v37 = vpop.f32.mrb[12].mxu0 }
 0x187   : > { %v725_v38 = vpack.c.bf16 %v707_v33, %v706_v35  ;;  %v634_v39 = vadd.f32 %v1383_v37, %v1874_v40  ;;  %v625_v42 = vpop.f32.mrb[13].mxu0 }
 0x188   : > { %v724_v43 = vpack.c.bf16 %v705_v36, %v704_v24  ;;  %v626_v41 = vadd.f32 %v1874_v40, %v625_v42  ;;  %v1384_v32 = vpop.f32.mrb[14].mxu0 }
 0x189   : > { %v686_v44 = vmul.f32 0.1, %v634_v39  ;;  %v637_v45 = vadd.f32 %v1384_v32, %v1874_v40  ;;  %v628_v46 = vpop.f32.mrb[15].mxu0 }
 0x18a   : > { %v684_v47 = vmul.f32 0.1, %v626_v41  ;;  %v629_v48 = vadd.f32 %v1874_v40, %v628_v46  ;;  %1403 = vmatprep.mubr.msk.bf16.mxu1 %vm740_vm5, %v724_v43 }
 0x18b   : > { %v687_v49 = vmul.f32 0.1, %v637_v45  ;;  %1404 = vmatmul.mubr.msk.bf16.gmra.mrb[8].mxu1 %vm740_vm5, %v725_v38  ;;  %v710_v51 = vmax.f32 %v634_v39, %v686_v44 }
 0x18c   : > { %v685_v50 = vmul.f32 0.1, %v629_v48  ;;  %v708_v53 = vmax.f32 %v626_v41, %v684_v47 }
 0x18d   : > { %v711_v52 = vmax.f32 %v637_v45, %v687_v49 }
 0x18e   : > { %v709_v54 = vmax.f32 %v629_v48, %v685_v50  ;;  %v1387_v55 = vpop.f32.mrb[16].mxu0 }
 0x18f   : > { %v727_v56 = vpack.c.bf16 %v711_v52, %v710_v51  ;;  %v650_v57 = vadd.f32 %v1387_v55, %v1874_v40  ;;  %v641_v58 = vpop.f32.mrb[17].mxu0 }
 0x190   : > { %v726_v59 = vpack.c.bf16 %v709_v54, %v708_v53  ;;  %v642_v60 = vadd.f32 %v1874_v40, %v641_v58  ;;  %v1388_v61 = vpop.f32.mrb[18].mxu0 }
 0x191   : > { %v690_v62 = vmul.f32 0.1, %v650_v57  ;;  %v653_v63 = vadd.f32 %v1388_v61, %v1874_v40  ;;  %v644_v0 = vpop.f32.mrb[19].mxu0 }
 0x192   : > { %v688_v1 = vmul.f32 0.1, %v642_v60  ;;  %v645_v2 = vadd.f32 %v1874_v40, %v644_v0  ;;  %1407 = vmatprep.mubr.msk.bf16.mxu1 %vm740_vm5, %v726_v59 }
 0x193   : > { %v691_v3 = vmul.f32 0.1, %v653_v63  ;;  %1408 = vmatmul.mubr.msk.bf16.gmra.mrb[12].mxu1 %vm740_vm5, %v727_v56  ;;  %v714_v8 = vmax.f32 %v650_v57, %v690_v62 }
 0x194   : > { %v689_v4 = vmul.f32 0.1, %v645_v2  ;;  %v712_v10 = vmax.f32 %v642_v60, %v688_v1 }
 0x195   : > { %v715_v9 = vmax.f32 %v653_v63, %v691_v3 }
 0x196   : > { %v713_v12 = vmax.f32 %v645_v2, %v689_v4  ;;  %v1391_v15 = vpop.f32.mrb[20].mxu0 }
 0x197   : > { %v729_v16 = vpack.c.bf16 %v715_v9, %v714_v8  ;;  %v666_v5 = vadd.f32 %v1391_v15, %v1874_v40  ;;  %v657_v17 = vpop.f32.mrb[21].mxu0 }
 0x198   : > { %v728_v18 = vpack.c.bf16 %v713_v12, %v712_v10  ;;  %v658_v19 = vadd.f32 %v1874_v40, %v657_v17  ;;  %v1392_v6 = vpop.f32.mrb[22].mxu0 }
 0x199   : > { %v694_v20 = vmul.f32 0.1, %v666_v5  ;;  %v669_v7 = vadd.f32 %v1392_v6, %v1874_v40  ;;  %v660_v11 = vpop.f32.mrb[23].mxu0 }
 0x19a   : > { %v692_v14 = vmul.f32 0.1, %v658_v19  ;;  %v661_v21 = vadd.f32 %v1874_v40, %v660_v11  ;;  %1411 = vmatprep.mubr.msk.bf16.mxu1 %vm740_vm5, %v728_v18  ;;  %v1916_v40 = vld [vmem:[%s2026_s4] ss:$0 sm:$0xff] }
 0x19b   : > { %v695_v22 = vmul.f32 0.1, %v669_v7  ;;  %1412 = vmatmul.mubr.msk.bf16.gmra.mrb[16].mxu1 %vm740_vm5, %v729_v16  ;;  %v718_v26 = vmax.f32 %v666_v5, %v694_v20 }
 0x19c   : > { %v693_v23 = vmul.f32 0.1, %v661_v21  ;;  %v716_v25 = vmax.f32 %v658_v19, %v692_v14 }
 0x19d   : > { %v719_v27 = vmax.f32 %v669_v7, %v695_v22 }
 0x19e   : > { %v717_v13 = vmax.f32 %v661_v21, %v693_v23 }
 0x19f   : > { %v731_v28 = vpack.c.bf16 %v719_v27, %v718_v26 }
 0x1a0   : > { %v730_v29 = vpack.c.bf16 %v717_v13, %v716_v25 }
 0x1a2   : > { %1415 = vmatprep.mubr.msk.bf16.mxu1 %vm740_vm5, %v730_v29 }
 0x1a3   : > { %1416 = vmatmul.mubr.msk.bf16.gmra.mrb[20].mxu1 %vm740_vm5, %v731_v28 }
 0x24e   : > { %v1397_v30 = vpop.f32.mrb[0].mxu1 }
 0x24f   : > { %v815_v31 = vpop.f32.mrb[1].mxu1  ;;  %v824_v35 = vadd.f32 %v1397_v30, %v1916_v40 }
 0x250   : > { %v1398_v34 = vpop.f32.mrb[2].mxu1  ;;  %v816_v36 = vadd.f32 %v1916_v40, %v815_v31 }
 0x251   : > { %v827_v33 = vadd.f32 %v1398_v34, %v1916_v40  ;;  %v818_v24 = vpop.f32.mrb[3].mxu1 }
 0x252   : > { %v819_v37 = vadd.f32 %v1916_v40, %v818_v24 }
 0x253   : > { %v1272_v38 = vpack.c.bf16 %v827_v33, %v824_v35 }
 0x254   : > { %v1267_v39 = vpack.c.bf16 %v819_v37, %v816_v36 }
 0x255   : > { %1324 = vst [vmem:[%s1924_s10 + $0x8] sm:$0xff] %v1272_v38  }
 0x256   : > { %1268 = vst [vmem:[%s1924_s10] sm:$0xff] %v1267_v39   ;;  %v1401_v42 = vpop.f32.mrb[4].mxu1 }
 0x257   : > { %v831_v43 = vpop.f32.mrb[5].mxu1  ;;  %v840_v32 = vadd.f32 %v1401_v42, %v1916_v40 }
 0x258   : > { %v1402_v41 = vpop.f32.mrb[6].mxu1  ;;  %v832_v46 = vadd.f32 %v1916_v40, %v831_v43 }
 0x259   : > { %v843_v44 = vadd.f32 %v1402_v41, %v1916_v40  ;;  %v834_v45 = vpop.f32.mrb[7].mxu1 }
 0x25a   : > { %v835_v47 = vadd.f32 %v1916_v40, %v834_v45 }
 0x25b   : > { %v1282_v48 = vpack.c.bf16 %v843_v44, %v840_v32 }
 0x25c   : > { %v1277_v49 = vpack.c.bf16 %v835_v47, %v832_v46 }
 0x25d   : > { %1326 = vst [vmem:[%s1924_s10 + $0x18] sm:$0xff] %v1282_v48  }
 0x25e   : > { %1325 = vst [vmem:[%s1924_s10 + $0x10] sm:$0xff] %v1277_v49   ;;  %v1405_v50 = vpop.f32.mrb[8].mxu1 }
 0x25f   : > { %v847_v51 = vpop.f32.mrb[9].mxu1  ;;  %v856_v53 = vadd.f32 %v1405_v50, %v1916_v40 }
 0x260   : > { %v1406_v52 = vpop.f32.mrb[10].mxu1  ;;  %v848_v56 = vadd.f32 %v1916_v40, %v847_v51 }
 0x261   : > { %v859_v54 = vadd.f32 %v1406_v52, %v1916_v40  ;;  %v850_v55 = vpop.f32.mrb[11].mxu1 }
 0x262   : > { %v851_v57 = vadd.f32 %v1916_v40, %v850_v55 }
 0x263   : > { %v1292_v58 = vpack.c.bf16 %v859_v54, %v856_v53 }
 0x264   : > { %v1287_v59 = vpack.c.bf16 %v851_v57, %v848_v56 }
 0x265   : > { %1328 = vst [vmem:[%s1924_s10 + $0x28] sm:$0xff] %v1292_v58  }
 0x266   : > { %1327 = vst [vmem:[%s1924_s10 + $0x20] sm:$0xff] %v1287_v59   ;;  %v1409_v60 = vpop.f32.mrb[12].mxu1 }
 0x267   : > { %v863_v61 = vpop.f32.mrb[13].mxu1  ;;  %v872_v63 = vadd.f32 %v1409_v60, %v1916_v40 }
 0x268   : > { %v1410_v62 = vpop.f32.mrb[14].mxu1  ;;  %v864_v2 = vadd.f32 %v1916_v40, %v863_v61 }
 0x269   : > { %v875_v0 = vadd.f32 %v1410_v62, %v1916_v40  ;;  %v866_v1 = vpop.f32.mrb[15].mxu1 }
 0x26a   : > { %v867_v3 = vadd.f32 %v1916_v40, %v866_v1 }
 0x26b   : > { %v1302_v4 = vpack.c.bf16 %v875_v0, %v872_v63 }
 0x26c   : > { %v1297_v8 = vpack.c.bf16 %v867_v3, %v864_v2 }
 0x26d   : > { %1330 = vst [vmem:[%s1924_s10 + $0x38] sm:$0xff] %v1302_v4  }
 0x26e   : > { %1329 = vst [vmem:[%s1924_s10 + $0x30] sm:$0xff] %v1297_v8   ;;  %v1413_v9 = vpop.f32.mrb[16].mxu1 }
 0x26f   : > { %v879_v10 = vpop.f32.mrb[17].mxu1  ;;  %v888_v15 = vadd.f32 %v1413_v9, %v1916_v40 }
 0x270   : > { %v1414_v12 = vpop.f32.mrb[18].mxu1  ;;  %v880_v17 = vadd.f32 %v1916_v40, %v879_v10 }
 0x271   : > { %v891_v16 = vadd.f32 %v1414_v12, %v1916_v40  ;;  %v882_v5 = vpop.f32.mrb[19].mxu1 }
 0x272   : > { %v883_v18 = vadd.f32 %v1916_v40, %v882_v5 }
 0x273   : > { %v1312_v19 = vpack.c.bf16 %v891_v16, %v888_v15 }
 0x274   : > { %v1307_v6 = vpack.c.bf16 %v883_v18, %v880_v17 }
 0x275   : > { %1332 = vst [vmem:[%s1924_s10 + $0x48] sm:$0xff] %v1312_v19  }
 0x276   : > { %1331 = vst [vmem:[%s1924_s10 + $0x40] sm:$0xff] %v1307_v6   ;;  %v1417_v20 = vpop.f32.mrb[20].mxu1 }
 0x277   : > { %v895_v7 = vpop.f32.mrb[21].mxu1  ;;  %v904_v14 = vadd.f32 %v1417_v20, %v1916_v40 }
 0x278   : > { %v1418_v11 = vpop.f32.mrb[22].mxu1  ;;  %v896_v23 = vadd.f32 %v1916_v40, %v895_v7 }
 0x279   : > { %v907_v21 = vadd.f32 %v1418_v11, %v1916_v40  ;;  %v898_v22 = vpop.f32.mrb[23].mxu1 }
 0x27a   : > { %v899_v26 = vadd.f32 %v1916_v40, %v898_v22 }
 0x27b   : > { %v1322_v27 = vpack.c.bf16 %v907_v21, %v904_v14 }
 0x27c   : > { %v1317_v25 = vpack.c.bf16 %v899_v26, %v896_v23 }
 0x27d   : > { %1334 = vst [vmem:[%s1924_s10 + $0x58] sm:$0xff] %v1322_v27  }
 0x27e   : > { %1333 = vst [vmem:[%s1924_s10 + $0x50] sm:$0xff] %v1317_v25  }
 0x27f   : > { %1515 = shalt.err (!%p1512_p6)
}
 0x280   : > { %s1516_s27 = scalar_lea.hbm %s1962_s17, 1536  ;;  %s1520_s14 = scalar_lea.hbm %s2027_s5, 6144 }
 0x281   : > { %p1517_p7 = scmp.ne.s32.totalorder %s1962_s17, %s1516_s27  ;;  %p1521_p11 = scmp.lt.u32.totalorder %s1962_s17, %s2027_s5 }
 0x282   : > { %p1522_p12 = scmp.lt.u32.totalorder %s1520_s14, %s1516_s27  ;;  %p1524_p0 = scmp.lt.u32.totalorder %s1516_s27, %s1962_s17 }
 0x283   : > { %p1518_p9 = pnand %p1517_p7, %p1684_p3 }
 0x284   : > { %p1523_p13 = por %p1522_p12, %p1521_p11 }
 0x285   : > { %p1519_p10 = pneg %p1518_p9 }
 0x286   : > { %p1525_p1 = por %p1524_p0, %p1523_p13 }
 0x288   : > { %p1526_p2 = pnand %p1525_p1, %p1519_p10 }
 0x28a   : > { %1529 = shalt.err (!%p1526_p2)
}
 0x28b   : > { %s1601_s16 = smov 64   ;;  %s1602_s30 = smov 4  }
 0x28c   : > { %1424 = dma.vmem_to_hbm [thread:$0]  (%p1684_p3), %s1964_s15, 1536, %s1962_s17, %s1970_s26, %s1601_s16, %s1601_s16, %s1602_s30  }
 0x28d PF: > { %p1430_p4 = scmp.ge.s32.totalorder %s1596_s25, 2  ;;  %s1061_s8 = sand.u32 1, %s1568_s18  }
 0x28e   : > { %s1062_s9 = scalar_lea.sflag [#allocation3], %s1061_s8 }
 0x28f   : > { %p1427_p5 = pnand %p1430_p4, %p1693_p8 }
 0x291   : > { %1563 = dma.done.wait (!%p1427_p5), %s1062_s9, 1536  }
 0x292   : > { %1565 = vsyncadd (!%p1427_p5), %s1062_s9, 4294965760  ;;  %s18_s25 = sadd.s32 1, %s1596_s25   ;;  %s2030_s18 = smov %s1572_s19 }
 0x293   : > { %p15_p6 = scmp.ge.s32.totalorder %s18_s25, 6   ;;  %s2031_s19 = smov %s1576_s20 }
 0x294   : > { %s2032_s20 = smov %s1702_s11  ;;  %s2033_s21 = smov %s1588_s23 }
 0x295   : > { %s2034_s22 = smov %s1592_s24  ;;  %s2035_s23 = smov %s2038_s28 }
 0x296   : > { %s2036_s24 = smov %s2042_s29  ;;  %17 = sbr.rel (!%p15_p6) target bundleno = 5 (0x5), region = 78 }
 0x29d   :  { %1067 = vsyncpa [#allocation3], 1 }
 0x29e   :  { %1069 = vsyncpa [#allocation3 + $0x1], 1 }

</bundles_post_ra>
